<compile_context>
chip_gen: v5e
topology: v5e:2x2
jax: 0.10.0
libtpu: 0.0.40
codegen_flags: <defaults>
</compile_context>

<pallas_src>
import jax
import jax.numpy as jnp
from jax.experimental import pallas as pl
from jax.experimental.pallas import tpu as pltpu

# ----------------------------------------------------------------------------
# Static "parameters": the polynomial coefficients (module __init__ arg).
# One coefficient is exactly 0.0 so the EPS-based index filtering is exercised.
# ----------------------------------------------------------------------------
EPS = 1e-9
COEFFS = [0.5, -1.0, 0.0, 0.25, 2.0, -0.125]          # degree-5 polynomial
INDICES = [i for i in range(len(COEFFS)) if abs(COEFFS[i]) > EPS]

# Trim trailing (near-)zero coefficients so Horner starts at the true degree.
_HORNER = list(COEFFS)
while len(_HORNER) > 1 and abs(_HORNER[-1]) <= EPS:
    _HORNER.pop()

_LANE_CHOICES = (1024, 512, 256, 128)   # widest lane-dense layout that divides n
_MIN_SPLIT_BYTES = 2 << 20              # below this, a multi-step grid is overhead


def _horner_flops_per_elt():
    """Muls + non-skipped adds of the unrolled Horner chain (for CostEstimate)."""
    deg = len(_HORNER) - 1
    if deg == 0:
        return 0
    flops = 1 + (1 if abs(_HORNER[deg - 1]) > EPS else 0)
    for c in _HORNER[: deg - 1]:
        flops += 1 + (1 if abs(c) > EPS else 0)
    return flops


_FLOPS_PER_ELT = _horner_flops_per_elt()


def _horner(x_f32):
    """Horner evaluation of the static polynomial (f32 in, f32 out)."""
    deg = len(_HORNER) - 1
    if deg == 0:
        c0 = _HORNER[0] if abs(_HORNER[0]) > EPS else 0.0
        return jnp.full(x_f32.shape, jnp.float32(c0))
    acc = jnp.float32(_HORNER[deg]) * x_f32
    if abs(_HORNER[deg - 1]) > EPS:
        acc = acc + jnp.float32(_HORNER[deg - 1])
    for c in reversed(_HORNER[: deg - 1]):
        acc = acc * x_f32
        if abs(c) > EPS:              # skip the add for (near-)zero coefficients
            acc = acc + jnp.float32(c)
    return acc


def _poly_kernel(x_ref, o_ref):
    """Elementwise polynomial on one lane-dense block (pure VPU work)."""
    # TODO(synk): integer input dtypes truncate here; the PyTorch module would
    # promote to float. All realistic uses (activations) are floating point.
    o_ref[...] = _horner(x_ref[...].astype(jnp.float32)).astype(o_ref.dtype)


def _physical_vmem_bytes():
    try:
        return int(pltpu.get_tpu_info().vmem_capacity_bytes)
    except Exception:
        return 64 << 20          # conservative (v7x-sized) fallback


def _choose_block_rows(rows, lanes, itemsize):
    """Pick a block height: one step for small inputs, else an even number of
    roughly equal, 8-row-aligned steps capped at a generation-aware budget."""
    # ~4 MiB blocks on 128 MiB-VMEM chips (v5e/v6e), ~2 MiB on v7x (64 MiB).
    budget = (4 << 20) if _physical_vmem_bytes() >= (128 << 20) else (2 << 20)
    max_block_rows = max(8, (budget // (lanes * itemsize)) // 8 * 8)

    total_bytes = rows * lanes * itemsize
    if rows <= max_block_rows and total_bytes < _MIN_SPLIT_BYTES:
        return rows              # single grid step; a split would be pure overhead

    steps = pl.cdiv(rows, max_block_rows)
    steps = max(2, steps + (steps % 2))              # even step count for 2 TCs
    block_rows = min(max_block_rows, ((pl.cdiv(rows, steps) + 7) // 8) * 8)
    return max(8, block_rows)


def _run_pallas(x2d):
    rows, lanes = x2d.shape
    itemsize = x2d.dtype.itemsize
    block_rows = _choose_block_rows(rows, lanes, itemsize)
    grid = (pl.cdiv(rows, block_rows),)
    n_elems = rows * lanes

    return pl.pallas_call(
        _poly_kernel,
        out_shape=jax.ShapeDtypeStruct((rows, lanes), x2d.dtype),
        grid_spec=pltpu.PrefetchScalarGridSpec(
            num_scalar_prefetch=0,
            grid=grid,
            in_specs=[pl.BlockSpec((block_rows, lanes), lambda i: (i, 0))],
            out_specs=pl.BlockSpec((block_rows, lanes), lambda i: (i, 0)),
        ),
        compiler_params=pltpu.CompilerParams(
            dimension_semantics=("parallel",),
            # 2 arrays x 2 double-buffers x <=4 MiB blocks + headroom; safely
            # below physical VMEM on v5e/v6e (128 MiB) and v7x (64 MiB).
            vmem_limit_bytes=32 << 20,
        ),
        cost_estimate=pl.CostEstimate(
            flops=_FLOPS_PER_ELT * n_elems,
            transcendentals=0,
            bytes_accessed=2 * n_elems * itemsize,   # memory-bound elementwise op
        ),
    )(x2d)


@jax.jit
def polynomial_evaluator(x):
    """Evaluate the fixed polynomial elementwise on x (any shape)."""
    orig_shape = x.shape
    orig_dtype = x.dtype

    flat = x.reshape(-1)
    n = flat.shape[0]
    if n == 0:
        return x

    # Widest lane count that divides n exactly; fall back to 128 + ragged tail.
    lanes = next((l for l in _LANE_CHOICES if n % l == 0), _LANE_CHOICES[-1])
    rem = n % lanes
    n_main = n - rem

    if rem == 0:
        out = _run_pallas(flat.reshape(n // lanes, lanes)).reshape(-1)
    elif n_main == 0:
        # Fewer than one lane-row of data: plain jnp is cheapest and correct.
        out = _horner(flat.astype(jnp.float32)).astype(orig_dtype)
    else:
        # Lane-aligned prefix through Pallas, tiny (<lanes) tail with plain jnp:
        # avoids the whole-array jnp.pad + out[:n] HBM round trips of v2.
        main2d = flat[:n_main].reshape(n_main // lanes, lanes)
        out_main = _run_pallas(main2d).reshape(-1)
        out_tail = _horner(flat[n_main:].astype(jnp.float32)).astype(orig_dtype)
        out = jnp.concatenate([out_main, out_tail])

    return out.reshape(orig_shape)


def _reference(x):
    """Pure-JAX reference mirroring the PyTorch module (power-sum form)."""
    acc = jnp.zeros_like(x)
    for i in INDICES:
        acc = acc + COEFFS[i] * (x ** i)
    return acc


if __name__ == "__main__":
    key = jax.random.PRNGKey(0)
    # NCHW input, as the PyTorch module would receive.
    x = jax.random.normal(key, (2, 4, 16, 16), dtype=jnp.float32)

    y = jax.block_until_ready(polynomial_evaluator(x))

    y_ref = _reference(x)
    assert y.shape == x.shape and y.dtype == x.dtype
    assert jnp.allclose(y, y_ref, atol=1e-5, rtol=1e-5)

    print("KERNEL_OK")
</pallas_src>

<mosaic_0001>
module attributes {stable_mosaic.version = 11 : i64} {
  func.func @_poly_kernel(%arg0: i32, %arg1: memref<2x1024xf32, #tpu.memory_space<vmem>>, %arg2: memref<2x1024xf32, #tpu.memory_space<vmem>>) attributes {dimension_semantics = [#tpu.dimension_semantics<parallel>], iteration_bounds = array<i64: 1>, scalar_prefetch = 0 : i64, scratch_operands = 0 : i64, tpu.core_type = #tpu.core_type<tc>, window_params = [{transform_indices = @transform_0, window_bounds = array<i64: 2, 1024>}, {transform_indices = @transform_1, window_bounds = array<i64: 2, 1024>}]} {
    %c0 = arith.constant 0 : index
    %c0_0 = arith.constant 0 : index
    %0 = vector.load %arg1[%c0, %c0_0] : memref<2x1024xf32, #tpu.memory_space<vmem>>, vector<2x1024xf32>
    %cst = arith.constant -1.250000e-01 : f32
    %1 = vector.broadcast %cst : f32 to vector<2x1024xf32>
    %2 = arith.mulf %1, %0 : vector<2x1024xf32>
    %cst_1 = arith.constant 2.000000e+00 : f32
    %3 = vector.broadcast %cst_1 : f32 to vector<2x1024xf32>
    %4 = arith.addf %2, %3 : vector<2x1024xf32>
    %5 = arith.mulf %4, %0 : vector<2x1024xf32>
    %cst_2 = arith.constant 2.500000e-01 : f32
    %6 = vector.broadcast %cst_2 : f32 to vector<2x1024xf32>
    %7 = arith.addf %5, %6 : vector<2x1024xf32>
    %8 = arith.mulf %7, %0 : vector<2x1024xf32>
    %9 = arith.mulf %8, %0 : vector<2x1024xf32>
    %cst_3 = arith.constant -1.000000e+00 : f32
    %10 = vector.broadcast %cst_3 : f32 to vector<2x1024xf32>
    %11 = arith.addf %9, %10 : vector<2x1024xf32>
    %12 = arith.mulf %11, %0 : vector<2x1024xf32>
    %cst_4 = arith.constant 5.000000e-01 : f32
    %13 = vector.broadcast %cst_4 : f32 to vector<2x1024xf32>
    %14 = arith.addf %12, %13 : vector<2x1024xf32>
    %c0_5 = arith.constant 0 : index
    %c0_6 = arith.constant 0 : index
    %15 = vector.load %arg2[%c0_5, %c0_6] : memref<2x1024xf32, #tpu.memory_space<vmem>>, vector<2x1024xf32>
    tpu.vector_store %arg2[%c0_5, %c0_6], %14 {strides = array<i32>} : memref<2x1024xf32, #tpu.memory_space<vmem>>, vector<2x1024xf32>,
    return
  }
  func.func @transform_0(%arg0: i32) -> (i32, i32) {
    %c0_i32 = arith.constant 0 : i32
    %c0_i32_0 = arith.constant 0 : i32
    return %arg0, %c0_i32 : i32, i32
  }
  func.func @transform_1(%arg0: i32) -> (i32, i32) {
    %c0_i32 = arith.constant 0 : i32
    %c0_i32_0 = arith.constant 0 : i32
    return %arg0, %c0_i32 : i32, i32
  }
}

</mosaic_0001>

<bundles_post_ra>
// kernel: polynomial_evaluator.1
= control target key start
LH: loop header
LB: loop body
LE: loop exit
PB: predicated region body
PF: predicated region fallthrough
CT: control target
= control target key end

     0   :  { %s56_s0 = inlined_call_operand.vmem [shape: f32[2,1024], index: 0, kind: input, shape index: {}]   ;;  %s57_s1 = inlined_call_operand.vmem [shape: f32[2,1024], index: 1, kind: output, shape index: {}]  }
   0x1   :  { %v8_v0 = vld [vmem:[%s56_s0] sm:$0xff]  ;;  %v9_v1 = vld [vmem:[%s56_s0 + $0x8] sm:$0xff] }
   0x2   :  { %v10_v2 = vmul.f32 -0.125, %v8_v0  ;;  %v11_v3 = vmul.f32 -0.125, %v9_v1 }
   0x4   :  { %v12_v4 = vadd.f32 2.0, %v10_v2  ;;  %v13_v5 = vadd.f32 2.0, %v11_v3 }
   0x6   :  { %v14_v6 = vmul.f32 %v12_v4, %v8_v0  ;;  %v15_v7 = vmul.f32 %v13_v5, %v9_v1 }
   0x8   :  { %v16_v8 = vadd.f32 0.25, %v14_v6  ;;  %v17_v9 = vadd.f32 0.25, %v15_v7 }
   0xa   :  { %v18_v10 = vmul.f32 %v16_v8, %v8_v0  ;;  %v19_v11 = vmul.f32 %v17_v9, %v9_v1 }
   0xc   :  { %v20_v12 = vmul.f32 %v18_v10, %v8_v0  ;;  %v21_v13 = vmul.f32 %v19_v11, %v9_v1 }
   0xe   :  { %v22_v14 = vadd.f32 -1.0, %v20_v12  ;;  %v23_v15 = vadd.f32 -1.0, %v21_v13 }
  0x10   :  { %v24_v16 = vmul.f32 %v22_v14, %v8_v0  ;;  %v25_v17 = vmul.f32 %v23_v15, %v9_v1 }
  0x12   :  { %v26_v18 = vadd.f32 0.5, %v24_v16  ;;  %v27_v19 = vadd.f32 0.5, %v25_v17 }
  0x14   :  { %28 = vst [vmem:[%s57_s1] sm:$0xff] %v26_v18 }
  0x15   :  { %29 = vst [vmem:[%s57_s1 + $0x8] sm:$0xff] %v27_v19 }

</bundles_post_ra>
